<compile_context>
chip_gen: v5e
topology: v5e:2x2
jax: 0.10.0
libtpu: 0.0.40
codegen_flags: <defaults>
</compile_context>

<pallas_src>
import jax
import jax.numpy as jnp
from jax.experimental import pallas as pl
from jax.experimental.pallas import tpu as pltpu

LN_EPS = 1e-5
LEAKY_SLOPE = 0.2
HID1 = 128
HID2 = 256


def _round_up(x, m):
    return ((x + m - 1) // m) * m


def _layernorm(x, gamma, beta):
    # x: [tb, D] float32, gamma/beta: [1, D] float32
    mean = jnp.mean(x, axis=-1, keepdims=True)
    xc = x - mean
    var = jnp.mean(xc * xc, axis=-1, keepdims=True)
    inv = jax.lax.rsqrt(var + LN_EPS)
    return xc * inv * gamma + beta


def _leaky_relu(x, slope=LEAKY_SLOPE):
    # slope < 1 -> max(x, slope*x) == leaky_relu(x); saves a compare+select.
    return jnp.maximum(x, slope * x)


def _semantic_embed_kernel(x_ref,
                           wcat_ref, bcat_ref,        # fused [w1 | wr], [b1 | br]
                           g1_ref, be1_ref,
                           w2_ref, b2_ref, g2_ref, be2_ref,
                           w3_ref, b3_ref,
                           o_ref):
    F = o_ref.shape[-1]

    # Fused layer-1 + residual matmul on the shared K=semantic_dim LHS.
    xb = x_ref[...].astype(jnp.bfloat16)
    hcat = jnp.dot(xb, wcat_ref[...], preferred_element_type=jnp.float32)
    hcat = hcat + bcat_ref[...]
    h = hcat[:, :HID1]            # Linear(semantic_dim -> 128) output
    # NOTE: keep F a multiple of 128 for a lane-aligned residual slice.
    res = hcat[:, HID1:HID1 + F]  # residual Linear(semantic_dim -> F) output

    # LayerNorm(128) + LeakyReLU (+ Dropout = identity) in f32.
    h = _leaky_relu(_layernorm(h, g1_ref[...], be1_ref[...]))

    # Linear(128 -> 256) + LayerNorm + LeakyReLU (+ Dropout = identity)
    h = jnp.dot(h.astype(jnp.bfloat16), w2_ref[...],
                preferred_element_type=jnp.float32) + b2_ref[...]
    h = _leaky_relu(_layernorm(h, g2_ref[...], be2_ref[...]))

    # Linear(256 -> feature_dim)
    emb = jnp.dot(h.astype(jnp.bfloat16), w3_ref[...],
                  preferred_element_type=jnp.float32) + b3_ref[...]

    o_ref[...] = (emb + res).astype(o_ref.dtype)


def init_params(key, semantic_dim, feature_dim=256, dtype=jnp.float32):
    """Deterministic synthetic parameters. Weights are [in, out]."""
    ks = jax.random.split(key, 8)

    def lin(k, fan_in, fan_out):
        kw, kb = jax.random.split(k)
        bound = 1.0 / jnp.sqrt(fan_in)
        w = jax.random.uniform(kw, (fan_in, fan_out), dtype, -bound, bound)
        b = jax.random.uniform(kb, (1, fan_out), dtype, -bound, bound)
        return w, b

    w1, b1 = lin(ks[0], semantic_dim, HID1)
    g1 = jnp.ones((1, HID1), dtype)
    be1 = jnp.zeros((1, HID1), dtype)

    w2, b2 = lin(ks[1], HID1, HID2)
    g2 = jnp.ones((1, HID2), dtype)
    be2 = jnp.zeros((1, HID2), dtype)

    w3, b3 = lin(ks[2], HID2, feature_dim)
    wr, br = lin(ks[3], semantic_dim, feature_dim)

    return dict(w1=w1, b1=b1, g1=g1, be1=be1,
                w2=w2, b2=b2, g2=g2, be2=be2,
                w3=w3, b3=b3, wr=wr, br=br)


def prepare_params(params):
    """One-time weight packing (call once, reuse across forwards).

    Fuses the layer-1 and residual weights (shared K = semantic_dim LHS) and
    casts MXU operands to bf16; biases / LayerNorm params stay f32.
    """
    f32 = jnp.float32
    return dict(
        wcat=jnp.concatenate([params["w1"], params["wr"]], axis=1).astype(jnp.bfloat16),
        bcat=jnp.concatenate([params["b1"], params["br"]], axis=1).astype(f32),
        g1=params["g1"].astype(f32), be1=params["be1"].astype(f32),
        w2=params["w2"].astype(jnp.bfloat16), b2=params["b2"].astype(f32),
        g2=params["g2"].astype(f32), be2=params["be2"].astype(f32),
        w3=params["w3"].astype(jnp.bfloat16), b3=params["b3"].astype(f32),
    )


def _chip_config():
    """Generation-aware tile cap / VMEM budget / TensorCore count."""
    kind = ""
    try:
        kind = jax.devices()[0].device_kind.lower()
    except Exception:  # pragma: no cover - defensive
        pass
    single_tc_small = any(t in kind for t in
                          ("v5e", "v5 lite", "v5litepod", "v6e", "v6 lite"))
    if single_tc_small:
        # v5e / v6e: 1 TensorCore per chip, 128 MiB physical VMEM.
        return dict(multi_tc=False, tile_cap=4096, vmem_limit=64 * 1024 * 1024)
    # v7x (2 TCs, 64 MiB VMEM) and unknown/other generations: conservative.
    return dict(multi_tc=True, tile_cap=2048, vmem_limit=32 * 1024 * 1024)


def _pick_tile(B, tile_b, tile_cap, multi_tc):
    """Batch tile: multiple of 8, scales with B, capped per generation."""
    b8 = _round_up(B, 8)
    want = _round_up(max(int(tile_b), 8), 8)
    # Scale up with very large batches (amortize per-grid-step overhead) while
    # keeping enough grid steps for DMA/compute pipelining.
    want = max(want, _round_up(pl.cdiv(B, 16), 8))
    tile = max(8, min(want, tile_cap, b8))
    # Only on multi-TensorCore chips (v7x): keep >=2 "parallel" grid steps so
    # both cores get a block. On single-TC chips the grid is a serial loop and
    # splitting just adds overhead.
    if multi_tc and pl.cdiv(b8, tile) < 2 and b8 >= 16:
        tile = _round_up(pl.cdiv(B, 2), 8)
    return tile


def semantic_embedding_forward(semantic, params, *, tile_b=1024, out_dtype=None):
    """Forward pass. `params` may be raw (init_params) or packed (prepare_params)."""
    if "wcat" not in params:
        params = prepare_params(params)

    B, S = semantic.shape
    F = params["w3"].shape[1]
    out_dtype = semantic.dtype if out_dtype is None else out_dtype

    cfg = _chip_config()
    tile = _pick_tile(B, tile_b, cfg["tile_cap"], cfg["multi_tc"])

    # No full-array padding: grid = cdiv(B, tile) and Pallas masks the ragged
    # last block's stores (all math is row-local). Only pad to the sublane
    # multiple (8) in the rare B % 8 != 0 case.
    x = semantic
    Bp = _round_up(B, 8)
    if Bp != B:
        x = jnp.pad(x, ((0, Bp - B), (0, 0)))
    grid = pl.cdiv(Bp, tile)

    def full(arr):
        # Resident weight/bias block: full array, same block every grid step.
        return pl.BlockSpec(arr.shape, lambda i: (0, 0))

    in_specs = [
        pl.BlockSpec((tile, S), lambda i: (i, 0)),          # x
        full(params["wcat"]), full(params["bcat"]),
        full(params["g1"]), full(params["be1"]),
        full(params["w2"]), full(params["b2"]),
        full(params["g2"]), full(params["be2"]),
        full(params["w3"]), full(params["b3"]),
    ]

    out = pl.pallas_call(
        _semantic_embed_kernel,
        out_shape=jax.ShapeDtypeStruct((Bp, F), out_dtype),
        grid_spec=pltpu.PrefetchScalarGridSpec(
            num_scalar_prefetch=0,
            grid=(grid,),
            in_specs=in_specs,
            out_specs=pl.BlockSpec((tile, F), lambda i: (i, 0)),
        ),
        compiler_params=pltpu.CompilerParams(
            dimension_semantics=("parallel",),
            vmem_limit_bytes=cfg["vmem_limit"],
        ),
    )(x, params["wcat"], params["bcat"],
      params["g1"], params["be1"],
      params["w2"], params["b2"], params["g2"], params["be2"],
      params["w3"], params["b3"])

    return out[:B] if out.shape[0] != B else out


def _reference_forward(semantic, p):
    # Pure f32 reference (matches the PyTorch module in eval mode).
    x = semantic.astype(jnp.float32)

    def ln(h, g, b):
        m = jnp.mean(h, axis=-1, keepdims=True)
        v = jnp.mean((h - m) ** 2, axis=-1, keepdims=True)
        return (h - m) / jnp.sqrt(v + LN_EPS) * g + b

    h = x @ p["w1"] + p["b1"]
    h = _leaky_relu(ln(h, p["g1"], p["be1"]))
    h = h @ p["w2"] + p["b2"]
    h = _leaky_relu(ln(h, p["g2"], p["be2"]))
    emb = h @ p["w3"] + p["b3"]
    res = x @ p["wr"] + p["br"]
    return (emb + res).astype(semantic.dtype)


if __name__ == "__main__":
    key = jax.random.PRNGKey(0)
    k_param, k_x, k_x2 = jax.random.split(key, 3)

    semantic_dim = 32
    feature_dim = 256

    params = init_params(k_param, semantic_dim, feature_dim)
    packed = prepare_params(params)   # one-time packing, reused across calls

    # ---- main check: batch = 16 --------------------------------------------
    batch = 16
    semantic = jax.random.normal(k_x, (batch, semantic_dim), jnp.float32)
    out = semantic_embedding_forward(semantic, packed)
    out = jax.block_until_ready(out)
    ref = _reference_forward(semantic, params)
    assert out.shape == (batch, feature_dim)
    # bf16 MXU operands with f32 accumulation -> loose tolerance vs f32 reference.
    assert jnp.allclose(out, ref, atol=5e-2, rtol=5e-2), "mismatch vs reference"

    # ---- ragged-tail check: B % tile != 0 (masked last block, no jnp.pad) ---
    batch2 = 24
    semantic2 = jax.random.normal(k_x2, (batch2, semantic_dim), jnp.float32)
    out2 = semantic_embedding_forward(semantic2, packed, tile_b=16)
    out2 = jax.block_until_ready(out2)
    ref2 = _reference_forward(semantic2, params)
    assert out2.shape == (batch2, feature_dim)
    assert jnp.allclose(out2, ref2, atol=5e-2, rtol=5e-2), "ragged-tail mismatch"

    print("KERNEL_OK")
</pallas_src>

<mosaic_0001>
module attributes {stable_mosaic.version = 11 : i64} {
  func.func @_semantic_embed_kernel(%arg0: i32, %arg1: memref<8x32xf32, #tpu.memory_space<vmem>>, %arg2: memref<32x384xbf16, #tpu.memory_space<vmem>>, %arg3: memref<1x384xf32, #tpu.memory_space<vmem>>, %arg4: memref<1x128xf32, #tpu.memory_space<vmem>>, %arg5: memref<1x128xf32, #tpu.memory_space<vmem>>, %arg6: memref<128x256xbf16, #tpu.memory_space<vmem>>, %arg7: memref<1x256xf32, #tpu.memory_space<vmem>>, %arg8: memref<1x256xf32, #tpu.memory_space<vmem>>, %arg9: memref<1x256xf32, #tpu.memory_space<vmem>>, %arg10: memref<256x256xbf16, #tpu.memory_space<vmem>>, %arg11: memref<1x256xf32, #tpu.memory_space<vmem>>, %arg12: memref<8x256xf32, #tpu.memory_space<vmem>>) attributes {dimension_semantics = [#tpu.dimension_semantics<parallel>], iteration_bounds = array<i64: 2>, scalar_prefetch = 0 : i64, scratch_operands = 0 : i64, tpu.core_type = #tpu.core_type<tc>, window_params = [{transform_indices = @transform_0, window_bounds = array<i64: 8, 32>}, {pipeline_mode = #tpu.pipeline_mode<synchronous>, transform_indices = @transform_1, window_bounds = array<i64: 32, 384>}, {pipeline_mode = #tpu.pipeline_mode<synchronous>, transform_indices = @transform_2, window_bounds = array<i64: 1, 384>}, {pipeline_mode = #tpu.pipeline_mode<synchronous>, transform_indices = @transform_3, window_bounds = array<i64: 1, 128>}, {pipeline_mode = #tpu.pipeline_mode<synchronous>, transform_indices = @transform_4, window_bounds = array<i64: 1, 128>}, {pipeline_mode = #tpu.pipeline_mode<synchronous>, transform_indices = @transform_5, window_bounds = array<i64: 128, 256>}, {pipeline_mode = #tpu.pipeline_mode<synchronous>, transform_indices = @transform_6, window_bounds = array<i64: 1, 256>}, {pipeline_mode = #tpu.pipeline_mode<synchronous>, transform_indices = @transform_7, window_bounds = array<i64: 1, 256>}, {pipeline_mode = #tpu.pipeline_mode<synchronous>, transform_indices = @transform_8, window_bounds = array<i64: 1, 256>}, {pipeline_mode = #tpu.pipeline_mode<synchronous>, transform_indices = @transform_9, window_bounds = array<i64: 256, 256>}, {pipeline_mode = #tpu.pipeline_mode<synchronous>, transform_indices = @transform_10, window_bounds = array<i64: 1, 256>}, {transform_indices = @transform_11, window_bounds = array<i64: 8, 256>}]} {
    %c0 = arith.constant 0 : index
    %c0_0 = arith.constant 0 : index
    %0 = vector.load %arg1[%c0, %c0_0] : memref<8x32xf32, #tpu.memory_space<vmem>>, vector<8x32xf32>
    %1 = arith.truncf %0 : vector<8x32xf32> to vector<8x32xbf16>
    %c0_1 = arith.constant 0 : index
    %c0_2 = arith.constant 0 : index
    %2 = vector.load %arg2[%c0_1, %c0_2] : memref<32x384xbf16, #tpu.memory_space<vmem>>, vector<32x384xbf16>
    %cst = arith.constant dense<0.000000e+00> : vector<8x384xf32>
    %3 = tpu.matmul %1, %2, %cst {dimension_numbers = #tpu.dot_dimension_numbers<[1], [0], [0], [1], [0, 0, 1, 1], [], []>} : vector<8x32xbf16>, vector<32x384xbf16>, vector<8x384xf32> -> vector<8x384xf32>
    %c0_3 = arith.constant 0 : index
    %c0_4 = arith.constant 0 : index
    %4 = vector.load %arg3[%c0_3, %c0_4] : memref<1x384xf32, #tpu.memory_space<vmem>>, vector<1x384xf32>
    %5 = vector.broadcast %4 : vector<1x384xf32> to vector<8x384xf32>
    %6 = arith.addf %3, %5 : vector<8x384xf32>
    %7 = vector.extract_strided_slice %6 {offsets = [0, 0], sizes = [8, 128], strides = [1, 1]} : vector<8x384xf32> to vector<8x128xf32>
    %8 = vector.extract_strided_slice %6 {offsets = [0, 128], sizes = [8, 256], strides = [1, 1]} : vector<8x384xf32> to vector<8x256xf32>
    %c0_5 = arith.constant 0 : index
    %c0_6 = arith.constant 0 : index
    %9 = vector.load %arg4[%c0_5, %c0_6] : memref<1x128xf32, #tpu.memory_space<vmem>>, vector<1x128xf32>
    %c0_7 = arith.constant 0 : index
    %c0_8 = arith.constant 0 : index
    %10 = vector.load %arg5[%c0_7, %c0_8] : memref<1x128xf32, #tpu.memory_space<vmem>>, vector<1x128xf32>
    %cst_9 = arith.constant dense<0.000000e+00> : vector<8xf32>
    %11 = vector.multi_reduction <add>, %7, %cst_9 [1] : vector<8x128xf32> to vector<8xf32>
    %12 = vector.shape_cast %11 : vector<8xf32> to vector<8x1xf32>
    %cst_10 = arith.constant 1.280000e+02 : f32
    %13 = vector.broadcast %cst_10 : f32 to vector<8x1xf32>
    %14 = arith.divf %12, %13 : vector<8x1xf32>
    %15 = vector.broadcast %14 : vector<8x1xf32> to vector<8x128xf32>
    %16 = arith.subf %7, %15 : vector<8x128xf32>
    %17 = arith.mulf %16, %16 : vector<8x128xf32>
    %cst_11 = arith.constant dense<0.000000e+00> : vector<8xf32>
    %18 = vector.multi_reduction <add>, %17, %cst_11 [1] : vector<8x128xf32> to vector<8xf32>
    %19 = vector.shape_cast %18 : vector<8xf32> to vector<8x1xf32>
    %cst_12 = arith.constant 1.280000e+02 : f32
    %20 = vector.broadcast %cst_12 : f32 to vector<8x1xf32>
    %21 = arith.divf %19, %20 : vector<8x1xf32>
    %cst_13 = arith.constant 9.99999974E-6 : f32
    %22 = vector.broadcast %cst_13 : f32 to vector<8x1xf32>
    %23 = arith.addf %21, %22 : vector<8x1xf32>
    %24 = math.rsqrt %23 : vector<8x1xf32>
    %25 = vector.broadcast %24 : vector<8x1xf32> to vector<8x128xf32>
    %26 = arith.mulf %16, %25 : vector<8x128xf32>
    %27 = vector.broadcast %9 : vector<1x128xf32> to vector<8x128xf32>
    %28 = arith.mulf %26, %27 : vector<8x128xf32>
    %29 = vector.broadcast %10 : vector<1x128xf32> to vector<8x128xf32>
    %30 = arith.addf %28, %29 : vector<8x128xf32>
    %cst_14 = arith.constant 2.000000e-01 : f32
    %31 = vector.broadcast %cst_14 : f32 to vector<8x128xf32>
    %32 = arith.mulf %31, %30 : vector<8x128xf32>
    %33 = arith.maximumf %30, %32 : vector<8x128xf32>
    %34 = arith.truncf %33 : vector<8x128xf32> to vector<8x128xbf16>
    %c0_15 = arith.constant 0 : index
    %c0_16 = arith.constant 0 : index
    %35 = vector.load %arg6[%c0_15, %c0_16] : memref<128x256xbf16, #tpu.memory_space<vmem>>, vector<128x256xbf16>
    %cst_17 = arith.constant dense<0.000000e+00> : vector<8x256xf32>
    %36 = tpu.matmul %34, %35, %cst_17 {dimension_numbers = #tpu.dot_dimension_numbers<[1], [0], [0], [1], [0, 0, 1, 1], [], []>} : vector<8x128xbf16>, vector<128x256xbf16>, vector<8x256xf32> -> vector<8x256xf32>
    %c0_18 = arith.constant 0 : index
    %c0_19 = arith.constant 0 : index
    %37 = vector.load %arg7[%c0_18, %c0_19] : memref<1x256xf32, #tpu.memory_space<vmem>>, vector<1x256xf32>
    %38 = vector.broadcast %37 : vector<1x256xf32> to vector<8x256xf32>
    %39 = arith.addf %36, %38 : vector<8x256xf32>
    %c0_20 = arith.constant 0 : index
    %c0_21 = arith.constant 0 : index
    %40 = vector.load %arg8[%c0_20, %c0_21] : memref<1x256xf32, #tpu.memory_space<vmem>>, vector<1x256xf32>
    %c0_22 = arith.constant 0 : index
    %c0_23 = arith.constant 0 : index
    %41 = vector.load %arg9[%c0_22, %c0_23] : memref<1x256xf32, #tpu.memory_space<vmem>>, vector<1x256xf32>
    %cst_24 = arith.constant dense<0.000000e+00> : vector<8xf32>
    %42 = vector.multi_reduction <add>, %39, %cst_24 [1] : vector<8x256xf32> to vector<8xf32>
    %43 = vector.shape_cast %42 : vector<8xf32> to vector<8x1xf32>
    %cst_25 = arith.constant 2.560000e+02 : f32
    %44 = vector.broadcast %cst_25 : f32 to vector<8x1xf32>
    %45 = arith.divf %43, %44 : vector<8x1xf32>
    %46 = vector.broadcast %45 : vector<8x1xf32> to vector<8x256xf32>
    %47 = arith.subf %39, %46 : vector<8x256xf32>
    %48 = arith.mulf %47, %47 : vector<8x256xf32>
    %cst_26 = arith.constant dense<0.000000e+00> : vector<8xf32>
    %49 = vector.multi_reduction <add>, %48, %cst_26 [1] : vector<8x256xf32> to vector<8xf32>
    %50 = vector.shape_cast %49 : vector<8xf32> to vector<8x1xf32>
    %cst_27 = arith.constant 2.560000e+02 : f32
    %51 = vector.broadcast %cst_27 : f32 to vector<8x1xf32>
    %52 = arith.divf %50, %51 : vector<8x1xf32>
    %cst_28 = arith.constant 9.99999974E-6 : f32
    %53 = vector.broadcast %cst_28 : f32 to vector<8x1xf32>
    %54 = arith.addf %52, %53 : vector<8x1xf32>
    %55 = math.rsqrt %54 : vector<8x1xf32>
    %56 = vector.broadcast %55 : vector<8x1xf32> to vector<8x256xf32>
    %57 = arith.mulf %47, %56 : vector<8x256xf32>
    %58 = vector.broadcast %40 : vector<1x256xf32> to vector<8x256xf32>
    %59 = arith.mulf %57, %58 : vector<8x256xf32>
    %60 = vector.broadcast %41 : vector<1x256xf32> to vector<8x256xf32>
    %61 = arith.addf %59, %60 : vector<8x256xf32>
    %cst_29 = arith.constant 2.000000e-01 : f32
    %62 = vector.broadcast %cst_29 : f32 to vector<8x256xf32>
    %63 = arith.mulf %62, %61 : vector<8x256xf32>
    %64 = arith.maximumf %61, %63 : vector<8x256xf32>
    %65 = arith.truncf %64 : vector<8x256xf32> to vector<8x256xbf16>
    %c0_30 = arith.constant 0 : index
    %c0_31 = arith.constant 0 : index
    %66 = vector.load %arg10[%c0_30, %c0_31] : memref<256x256xbf16, #tpu.memory_space<vmem>>, vector<256x256xbf16>
    %cst_32 = arith.constant dense<0.000000e+00> : vector<8x256xf32>
    %67 = tpu.matmul %65, %66, %cst_32 {dimension_numbers = #tpu.dot_dimension_numbers<[1], [0], [0], [1], [0, 0, 1, 1], [], []>} : vector<8x256xbf16>, vector<256x256xbf16>, vector<8x256xf32> -> vector<8x256xf32>
    %c0_33 = arith.constant 0 : index
    %c0_34 = arith.constant 0 : index
    %68 = vector.load %arg11[%c0_33, %c0_34] : memref<1x256xf32, #tpu.memory_space<vmem>>, vector<1x256xf32>
    %69 = vector.broadcast %68 : vector<1x256xf32> to vector<8x256xf32>
    %70 = arith.addf %67, %69 : vector<8x256xf32>
    %71 = arith.addf %70, %8 : vector<8x256xf32>
    %c0_35 = arith.constant 0 : index
    %c0_36 = arith.constant 0 : index
    %72 = vector.load %arg12[%c0_35, %c0_36] : memref<8x256xf32, #tpu.memory_space<vmem>>, vector<8x256xf32>
    tpu.vector_store %arg12[%c0_35, %c0_36], %71 {strides = array<i32>} : memref<8x256xf32, #tpu.memory_space<vmem>>, vector<8x256xf32>,
    return
  }
  func.func @transform_0(%arg0: i32) -> (i32, i32) {
    %c0_i32 = arith.constant 0 : i32
    %c0_i32_0 = arith.constant 0 : i32
    return %arg0, %c0_i32 : i32, i32
  }
  func.func @transform_1(%arg0: i32) -> (i32, i32) {
    %c0_i32 = arith.constant 0 : i32
    %c0_i32_0 = arith.constant 0 : i32
    %c0_i32_1 = arith.constant 0 : i32
    return %c0_i32, %c0_i32_0 : i32, i32
  }
  func.func @transform_2(%arg0: i32) -> (i32, i32) {
    %c0_i32 = arith.constant 0 : i32
    %c0_i32_0 = arith.constant 0 : i32
    %c0_i32_1 = arith.constant 0 : i32
    return %c0_i32, %c0_i32_0 : i32, i32
  }
  func.func @transform_3(%arg0: i32) -> (i32, i32) {
    %c0_i32 = arith.constant 0 : i32
    %c0_i32_0 = arith.constant 0 : i32
    %c0_i32_1 = arith.constant 0 : i32
    return %c0_i32, %c0_i32_0 : i32, i32
  }
  func.func @transform_4(%arg0: i32) -> (i32, i32) {
    %c0_i32 = arith.constant 0 : i32
    %c0_i32_0 = arith.constant 0 : i32
    %c0_i32_1 = arith.constant 0 : i32
    return %c0_i32, %c0_i32_0 : i32, i32
  }
  func.func @transform_5(%arg0: i32) -> (i32, i32) {
    %c0_i32 = arith.constant 0 : i32
    %c0_i32_0 = arith.constant 0 : i32
    %c0_i32_1 = arith.constant 0 : i32
    return %c0_i32, %c0_i32_0 : i32, i32
  }
  func.func @transform_6(%arg0: i32) -> (i32, i32) {
    %c0_i32 = arith.constant 0 : i32
    %c0_i32_0 = arith.constant 0 : i32
    %c0_i32_1 = arith.constant 0 : i32
    return %c0_i32, %c0_i32_0 : i32, i32
  }
  func.func @transform_7(%arg0: i32) -> (i32, i32) {
    %c0_i32 = arith.constant 0 : i32
    %c0_i32_0 = arith.constant 0 : i32
    %c0_i32_1 = arith.constant 0 : i32
    return %c0_i32, %c0_i32_0 : i32, i32
  }
  func.func @transform_8(%arg0: i32) -> (i32, i32) {
    %c0_i32 = arith.constant 0 : i32
    %c0_i32_0 = arith.constant 0 : i32
    %c0_i32_1 = arith.constant 0 : i32
    return %c0_i32, %c0_i32_0 : i32, i32
  }
  func.func @transform_9(%arg0: i32) -> (i32, i32) {
    %c0_i32 = arith.constant 0 : i32
    %c0_i32_0 = arith.constant 0 : i32
    %c0_i32_1 = arith.constant 0 : i32
    return %c0_i32, %c0_i32_0 : i32, i32
  }
  func.func @transform_10(%arg0: i32) -> (i32, i32) {
    %c0_i32 = arith.constant 0 : i32
    %c0_i32_0 = arith.constant 0 : i32
    %c0_i32_1 = arith.constant 0 : i32
    return %c0_i32, %c0_i32_0 : i32, i32
  }
  func.func @transform_11(%arg0: i32) -> (i32, i32) {
    %c0_i32 = arith.constant 0 : i32
    %c0_i32_0 = arith.constant 0 : i32
    return %arg0, %c0_i32 : i32, i32
  }
}

</mosaic_0001>

<bundles_post_ra>
// kernel: tpu_custom_call.1
= control target key start
LH: loop header
LB: loop body
LE: loop exit
PB: predicated region body
PF: predicated region fallthrough
CT: control target
= control target key end

     0   :  { %s2225_s0 = inlined_call_operand.hbm [shape: f32[16,32], index: 0, kind: input, shape index: {}]   ;;  %s2226_s1 = inlined_call_operand.hbm [shape: bf16[32,384], index: 1, kind: input, shape index: {}]   ;;  %s2227_s2 = inlined_call_operand.hbm [shape: f32[1,384], index: 2, kind: input, shape index: {}]   ;;  %s2228_s3 = inlined_call_operand.hbm [shape: f32[1,128], index: 3, kind: input, shape index: {}]   ;;  %s2229_s4 = inlined_call_operand.hbm [shape: f32[1,128], index: 4, kind: input, shape index: {}]   ;;  %s2230_s5 = inlined_call_operand.hbm [shape: bf16[128,256], index: 5, kind: input, shape index: {}]   ;;  %s2231_s6 = inlined_call_operand.vmem [shape: f32[1,256], index: 6, kind: input, shape index: {}]   ;;  %s2232_s7 = inlined_call_operand.vmem [shape: f32[1,256], index: 7, kind: input, shape index: {}]   ;;  %s2233_s8 = inlined_call_operand.vmem [shape: f32[1,256], index: 8, kind: input, shape index: {}]   ;;  %s2234_s9 = inlined_call_operand.hbm [shape: bf16[256,256], index: 9, kind: input, shape index: {}]   ;;  %s2235_s10 = inlined_call_operand.vmem [shape: f32[1,256], index: 10, kind: input, shape index: {}]   ;;  %s2236_s11 = inlined_call_operand.hbm [shape: f32[16,256], index: 11, kind: output, shape index: {}]  }
   0x1   :  { %2237 = sst [smem:[#allocation20_spill]] %s2226_s1 }
   0x2   :  { %2238 = sst [smem:[#allocation21_spill]] %s2227_s2 }
   0x3   :  { %2239 = sst [smem:[#allocation22_spill]] %s2228_s3 }
   0x4   :  { %2240 = sst [smem:[#allocation23_spill]] %s2229_s4 }
   0x5   :  { %2241 = sst [smem:[#allocation24_spill]] %s2230_s5 }
   0x6   :  { %2242 = sst [smem:[#allocation25_spill]] %s2234_s9 }
   0x7   :  { %16 = vsyncpa [#allocation3], 0 }
   0x8   :  { %18 = vsyncpa [#allocation3 + $0x1], 0 }
   0x9   :  { %19 = vsyncpa [#allocation6], 0 }
   0xa   :  { %20 = vsyncpa [#allocation9], 0 }
   0xb   :  { %21 = vsyncpa [#allocation12], 0 }
   0xc   :  { %22 = vsyncpa [#allocation4], 0 }
   0xd   :  { %24 = vsyncpa [#allocation4 + $0x1], 0  ;;  %s1995_s17 = smov 0   ;;  %s1997_s18 = smov 0  }
   0xe   :  { %s1999_s19 = smov 0   ;;  %s2001_s20 = smov 0  }
   0xf LB: > { %s2243_s1 = sld [smem:[#allocation20_spill]]  ;;  %s2019_s24 = sadd.s32 4294967295, %s1921_s20   ;;  %s1921_s20 = sphi %s2001_s20, %s2260_s20   ;;  %s1917_s19 = sphi %s1999_s19, %s2259_s19   ;;  %s1913_s18 = sphi %s1997_s18, %s2258_s18   ;;  %s1909_s17 = sphi %s1995_s17, %s2257_s17  }
  0x10   : > { %p1212_p0 = scmp.ge.s32.totalorder %s1921_s20, 1  ;;  %p51_p1 = scmp.eq.s32.totalorder %s2019_s24, 0 }
  0x11   : > { %p297_p2 = scmp.lt.s32.totalorder %s1921_s20, 3  ;;  %s1923_s26 = smov [#allocation5]  }
  0x12   : > { %s310_s27 = sshll.u32 %s1923_s26, 4  ;;  %s2245_s3 = sld [smem:[#allocation22_spill]]  ;;  %s311_s27 = int_to_ptr.vmem [resolvable:$true] %s310_s27 }
  0x13   : > { %p2024_p3 = pnand %p1212_p0, %p297_p2  ;;  %s2247_s5 = sld [smem:[#allocation24_spill]] }
  0x14   : > { %s1924_s16 = smov [#allocation8]   ;;  %s1925_s22 = smov 192  }
  0x15   : > { %s308_s23 = sshll.u32 %s2243_s1, 4  ;;  %p1538_p4 = pneg %p2024_p3  ;;  %s309_s23 = int_to_ptr.hbm [resolvable:$true] %s308_s23 }
  0x16   : > { %s337_s21 = sshll.u32 %s1924_s16, 4  ;;  %s1926_s26 = smov 12   ;;  %s338_s21 = int_to_ptr.vmem [resolvable:$true] %s337_s21 }
  0x17   : > { %p2036_p6 = pnand %p1538_p4, %p51_p1  ;;  %s1927_s28 = smov [#allocation11]  }
  0x18   : > { %s335_s30 = sshll.u32 %s2245_s3, 4  ;;  %s360_s29 = sshll.u32 %s1927_s28, 4  ;;  %s336_s30 = int_to_ptr.hbm [resolvable:$true] %s335_s30  ;;  %s361_s29 = int_to_ptr.vmem [resolvable:$true] %s360_s29 }
  0x19   : > { %s358_s15 = sshll.u32 %s2247_s5, 4  ;;  %s2248_s2 = sld [smem:[#allocation21_spill]]  ;;  %s359_s15 = int_to_ptr.hbm [resolvable:$true] %s358_s15 }
  0x1a   : > { %1541 = dma.hbm_to_vmem [thread:$0]  (!%p2036_p6), %s309_s23, 768, %s311_s27, [#allocation6], %s1925_s22, %s1925_s22, %s1926_s26  }
  0x1b   : > { %1547 = dma.hbm_to_vmem [thread:$0]  (!%p2036_p6), %s336_s30, 16, %s338_s21, [#allocation9]  }
  0x1c   : > { %s1928_s14 = smov 128   ;;  %s1929_s5 = smov 8  }
  0x1d   : > { %1553 = dma.hbm_to_vmem [thread:$0]  (!%p2036_p6), %s359_s15, 2048, %s361_s29, [#allocation12], %s1928_s14, %s1928_s14, %s1929_s5  }
  0x1e   : > { %s1930_s23 = smov [#allocation7]   ;;  %s2249_s4 = sld [smem:[#allocation23_spill]] }
  0x1f   : > { %s323_s13 = sshll.u32 %s2248_s2, 4  ;;  %s325_s27 = sshll.u32 %s1930_s23, 4  ;;  %s324_s13 = int_to_ptr.hbm [resolvable:$true] %s323_s13  ;;  %s326_s27 = int_to_ptr.vmem [resolvable:$true] %s325_s27 }
  0x20   : > { %1544 = dma.hbm_to_vmem [thread:$0]  (!%p2036_p6), %s324_s13, 48, %s326_s27, [#allocation6]  }
  0x21   : > { %s2250_s9 = sld [smem:[#allocation25_spill]]  ;;  %s1931_s21 = smov [#allocation10]  }
  0x22   : > { %s349_s26 = sshll.u32 %s1931_s21, 4  ;;  %s1932_s28 = smov [#allocation13]   ;;  %s350_s26 = int_to_ptr.vmem [resolvable:$true] %s349_s26 }
  0x23   : > { %s383_s29 = sshll.u32 %s1932_s28, 4  ;;  %s1211_s13 = sadd.s32 4294967294, %s1921_s20   ;;  %s384_s29 = int_to_ptr.vmem [resolvable:$true] %s383_s29 }
  0x24   : > { %s347_s30 = sshll.u32 %s2249_s4, 4  ;;  %s2066_s23 = sadd.s32 1, %s1921_s20   ;;  %s348_s30 = int_to_ptr.hbm [resolvable:$true] %s347_s30 }
  0x25   : > { %1550 = dma.hbm_to_vmem [thread:$0]  (!%p2036_p6), %s348_s30, 16, %s350_s26, [#allocation9]  }
  0x26   : > { %s34_s27 = ssub.s32 %s1921_s20, %s2066_s23  ;;  %s37_s16 = sadd.s32 1, %s1917_s19 }
  0x27   : > { %s381_s15 = sshll.u32 %s2250_s9, 4  ;;  %p35_p7 = scmp.eq.s32.totalorder %s34_s27, 0  ;;  %s382_s15 = int_to_ptr.hbm [resolvable:$true] %s381_s15 }
  0x28   : > { %1556 = dma.hbm_to_vmem [thread:$0]  (!%p2036_p6), %s382_s15, 4096, %s384_s29, [#allocation12], %s1928_s14, %s1928_s14, %s1929_s5  }
  0x29   : > { %p44_p8 = scmp.ne.s32.totalorder %s1917_s19, %s1913_s18  ;;  %p45_p9 = scmp.eq.s32.totalorder %s1921_s20, 0 }
  0x2a   : > { %p50_p10 = scmp.ne.s32.totalorder %s1913_s18, %s1909_s17  ;;  %p284_p13 = scmp.eq.s32.totalorder %s2019_s24, 1 }
  0x2b   : > { %s2077_s22 = scalar_select %p35_p7, %s1917_s19, %s37_s16  }
  0x2c   : > { %p2079_p11 = por %p45_p9, %p44_p8  ;;  %p2085_p12 = por %p51_p1, %p50_p10 }
  0x2d   : > { %p290_p0 = scmp.eq.s32.totalorder %s1211_s13, 1  ;;  %p1571_p2 = scmp.lt.s32.totalorder %s1921_s20, 2 }
  0x2e   : > { %s400_s12 = sand.u32 1, %s1917_s19   ;;  %p2092_p4 = por %p284_p13, %p44_p8 }
  0x2f   : > { %p2096_p6 = por %p290_p0, %p50_p10  ;;  %s1220_s3 = sshll.u32 %s400_s12, 3 }
  0x30   : > { %s1221_s15 = sshll.u32 %s1921_s20, 3  ;;  %s404_s29 = scalar_lea.vmem [#allocation2], %s1220_s3 }
  0x31   : > { %s408_s28 = scalar_lea.hbm %s2225_s0, %s1221_s15  ;;  %s412_s27 = sshll.u32 %s404_s29, 4  ;;  %s413_s27 = int_to_ptr.vmem [resolvable:$true] %s412_s27 }
  0x32   : > { %s410_s16 = sshll.u32 %s408_s28, 4  ;;  %p2106_p7 = pnand %p1571_p2, %p2079_p11  ;;  %s411_s16 = int_to_ptr.hbm [resolvable:$true] %s410_s16 }
  0x33   : > { %s401_s2 = scalar_lea.sflag [#allocation3], %s400_s12  ;;  %s1813_s4 = sshra.s32 %s411_s16, 4  ;;  %s1814_s4 = int_to_ptr.hbm [resolvable:$true] %s1813_s4 }
  0x34   : > { %s1815_s9 = scalar_lea.hbm %s1814_s4, 8  ;;  %p1817_p9 = pneg %p2106_p7 }
  0x35   : > { %p1816_p8 = scmp.ne.s32.totalorder %s1814_s4, %s1815_s9  ;;  %s1820_s21 = scalar_lea.hbm %s2225_s0, 16 }
  0x36   : > { %p1821_p11 = scmp.lt.s32.totalorder %s1814_s4, %s2225_s0  ;;  %p1822_p0 = scmp.lt.s32.totalorder %s1820_s21, %s1815_s9 }
  0x37   : > { %p1818_p10 = pnand %p1817_p9, %p1816_p8 }
  0x38   : > { %p1823_p2 = por %p1822_p0, %p1821_p11 }
  0x39   : > { %p1819_p13 = pneg %p1818_p10 }
  0x3b   : > { %p1824_p5 = pnand %p1823_p2, %p1819_p13 }
  0x3d   : > { %1827 = shalt.err (!%p1824_p5)
}
  0x3e   : > { %1560 = dma.hbm_to_vmem [thread:$0]  (!%p2106_p7), %s411_s16, 128, %s413_s27, %s401_s2  }
  0x3f   : > { %421 = sbr.rel (%p2024_p3) target bundleno = 1038 (0x40e), region = 64  ;;  %s2123_s12 = sand.u32 (!%p2024_p3), 1, %s1913_s18  }
  0x40   : > { %s1223_s28 = sshll.u32 (!%p2024_p3), %s2123_s12, 3  ;;  %s424_s29 = scalar_lea.sflag (!%p2024_p3), [#allocation3], %s2123_s12 }
  0x41   : > { %s427_s3 = scalar_lea.vmem (!%p2024_p3), [#allocation2], %s1223_s28 }
  0x44   : > { %1888 = dma.done.wait (%p2085_p12), %s424_s29, 128  }
  0x45   : > { %1890 = vsyncadd (%p2085_p12), %s424_s29, 4294967168 }
  0x46   : > { %1892 = dma.done.wait (%p51_p1), [#allocation6], 816  }
  0x47   : > { %1894 = vsyncadd (%p51_p1), [#allocation6], 4294966480 }
  0x48   : > { %1896 = dma.done.wait (%p51_p1), [#allocation9], 32  }
  0x49   : > { %1898 = vsyncadd (%p51_p1), [#allocation9], 4294967264 }
  0x4a   : > { %1900 = dma.done.wait (%p51_p1), [#allocation12], 6144  }
  0x4b   : > { %1902 = vsyncadd (%p51_p1), [#allocation12], 4294961152  ;;  %v1245_v0 = vld [vmem:[#allocation5 + $0x18] sm:$0xf]  ;;  %v1459_v1 = vld [vmem:[#allocation5 + $0x20] sm:$0xf0] }
  0x4c   : > { %v1233_v2 = vld [vmem:[#allocation5] sm:$0xf]  ;;  %v1246_v3 = vor.u32 %v1459_v1, %v1245_v0  ;;  %v1456_v4 = vld [vmem:[#allocation5 + $0x8] sm:$0xf0]  ;;  %v498_v6 = vld [vmem:[%s427_s3] sm:$0xff]  ;;  %vm548_vm0 = vcmask 261120  }
  0x4d   : > { %v1234_v5 = vor.u32 %v1456_v4, %v1233_v2  ;;  %v2143_v7 = vpack.c.bf16 %v498_v6, %v498_v6  ;;  %v2147_v8 = vld [vmem:[#allocation7] sm:$0x7]  ;;  %v1933_v13 = vmov 128.0   ;;  %v1316_v24 = vld [vmem:[#allocation11 + $0x70] sm:$0xf]  ;;  %s1230_s15 = sshll.u32 %s2123_s12, 4 }
  0x4e   : > { %558 = vmatpush.bf16.msra.mxu1 %v1246_v3  ;;  %v510_v9 = vperm.slane %v2147_v8, 0  ;;  %1625 = vrcp.f32 %v1933_v13  ;;  %v1476_v25 = vld [vmem:[#allocation11 + $0x74] sm:$0xf0]  ;;  %v1475_v26 = vld [vmem:[#allocation11 + $0x74] sm:$0xf]  ;;  %s1509_s21 = sshll.u32 %s2019_s24, 4 }
  0x4f   : > { %v1317_v27 = vor.u32 %v1476_v25, %v1316_v24  ;;  %v1318_v28 = vld [vmem:[#allocation11 + $0x78] sm:$0xf0]  ;;  %v1308_v30 = vld [vmem:[#allocation11 + $0x60] sm:$0xf]  ;;  %v1474_v31 = vld [vmem:[#allocation11 + $0x64] sm:$0xf0]  ;;  %s1079_s28 = scalar_lea.hbm %s2236_s11, %s1509_s21 }
  0x50   : > { %v1321_v29 = vor.u32 %v1475_v26, %v1318_v28  ;;  %v1473_v32 = vld [vmem:[#allocation11 + $0x64] sm:$0xf]  ;;  %v1309_v33 = vor.u32 %v1474_v31, %v1308_v30  ;;  %v1310_v34 = vld [vmem:[#allocation11 + $0x68] sm:$0xf0]  ;;  %v1300_v36 = vld [vmem:[#allocation11 + $0x50] sm:$0xf] }
  0x51   : > { %733 = vmatpush.bf16.msra.mxu3 %v1317_v27  ;;  %v1313_v35 = vor.u32 %v1473_v32, %v1310_v34  ;;  %v1472_v37 = vld [vmem:[#allocation11 + $0x54] sm:$0xf0]  ;;  %v1471_v38 = vld [vmem:[#allocation11 + $0x54] sm:$0xf]  ;;  %v1302_v40 = vld [vmem:[#allocation11 + $0x58] sm:$0xf0] }
  0x52   : > { %559 = vmatpush.bf16.msra.mxu1 %v1234_v5  ;;  %746 = vmatpush.bf16.msra.mxu0 %v1321_v29  ;;  %v1301_v39 = vor.u32 %v1472_v37, %v1300_v36  ;;  %v1305_v41 = vor.u32 %v1471_v38, %v1302_v40  ;;  %v1292_v42 = vld [vmem:[#allocation11 + $0x40] sm:$0xf]  ;;  %v1470_v43 = vld [vmem:[#allocation11 + $0x44] sm:$0xf0]  ;;  %v1469_v44 = vld [vmem:[#allocation11 + $0x44] sm:$0xf] }
  0x53   : > { %v1293_v45 = vor.u32 %v1470_v43, %v1292_v42  ;;  %v1294_v46 = vld [vmem:[#allocation11 + $0x48] sm:$0xf0]  ;;  %v1284_v48 = vld [vmem:[#allocation11 + $0x30] sm:$0xf]  ;;  %v1468_v49 = vld [vmem:[#allocation11 + $0x34] sm:$0xf0] }
  0x54   : > { %v1626_v14 = vpop.eup %1625  ;;  %v1297_v47 = vor.u32 %v1469_v44, %v1294_v46  ;;  %v1467_v50 = vld [vmem:[#allocation11 + $0x34] sm:$0xf]  ;;  %v1285_v51 = vor.u32 %v1468_v49, %v1284_v48  ;;  %v1286_v52 = vld [vmem:[#allocation11 + $0x38] sm:$0xf0]  ;;  %v1276_v54 = vld [vmem:[#allocation11 + $0x20] sm:$0xf] }
  0x55   : > { %1255 = vmatmul.msk.bf16.vlgmr.msra.gmra.mxu1 %vm548_vm0, %v2143_v7  ;;  %v596_v15 = vmul.f32 128.0, %v1626_v14  ;;  %vm600_vm1 = vweird.f32 %v1626_v14  ;;  %734 = vmatpush.bf16.msra.mxu3 %v1309_v33  ;;  %v1289_v53 = vor.u32 %v1467_v50, %v1286_v52  ;;  %v1466_v55 = vld [vmem:[#allocation11 + $0x24] sm:$0xf0]  ;;  %v1465_v56 = vld [vmem:[#allocation11 + $0x24] sm:$0xf]  ;;  %v1934_v38 = vmov 256.0  }
  0x56   : > { %747 = vmatpush.bf16.msra.mxu0 %v1313_v35  ;;  %v1277_v57 = vor.u32 %v1466_v55, %v1276_v54  ;;  %v1278_v58 = vld [vmem:[#allocation11 + $0x28] sm:$0xf0]  ;;  %v1268_v59 = vld [vmem:[#allocation11 + $0x10] sm:$0xf]  ;;  %v1464_v60 = vld [vmem:[#allocation11 + $0x14] sm:$0xf0] }
  0x57   : > { %v597_v16 = vsub.f32 1.0, %v596_v15  ;;  %v1281_v61 = vor.u32 %v1465_v56, %v1278_v58  ;;  %v1463_v62 = vld [vmem:[#allocation11 + $0x14] sm:$0xf]  ;;  %v1270_v63 = vld [vmem:[#allocation11 + $0x18] sm:$0xf0]  ;;  %v1269_v0 = vor.u32 %v1464_v60, %v1268_v59  ;;  %s496_s29 = scalar_lea.vmem [#allocation14], %s1230_s15 }
  0x58   : > { %v1273_v1 = vor.u32 %v1463_v62, %v1270_v63  ;;  %v1260_v2 = vld [vmem:[#allocation11] sm:$0xf]  ;;  %v1462_v3 = vld [vmem:[#allocation11 + $0x4] sm:$0xf0]  ;;  %v1461_v4 = vld [vmem:[#allocation11 + $0x4] sm:$0xf] }
  0x59   : > { %v598_v17 = vmul.f32 %v1626_v14, %v597_v16  ;;  %735 = vmatpush.bf16.msra.mxu3 %v1301_v39  ;;  %v1262_v5 = vld [vmem:[#allocation11 + $0x8] sm:$0xf0]  ;;  %v1261_v6 = vor.u32 %v1462_v3, %v1260_v2  ;;  %v1624_v24 = vld [vmem:[#allocation10] ss:$0 sm:$0xff]  ;;  %v647_v29 = vld [vmem:[%s2231_s6] sm:$0x3] }
  0x5a   : > { %748 = vmatpush.bf16.msra.mxu0 %v1305_v41  ;;  %v650_v31 = vperm.slane %v647_v29, 1  ;;  %v649_v32 = vperm.slane %v647_v29, 0  ;;  %v1458_v39 = vld [vmem:[#allocation5 + $0x1c] sm:$0xf]  ;;  %v1247_v40 = vld [vmem:[#allocation5 + $0x24] sm:$0xf0] }
  0x5b   : > { %v599_v18 = vadd.f32 %v1626_v14, %v598_v17  ;;  %v1253_v41 = vld [vmem:[#allocation5 + $0x20] sm:$0xf]  ;;  %v1250_v42 = vor.u32 %v1458_v39, %v1247_v40  ;;  %v1460_v43 = vld [vmem:[#allocation5 + $0x28] sm:$0xf0]  ;;  %v1455_v58 = vld [vmem:[#allocation5 + $0x4] sm:$0xf] }
  0x5c   : > { %v1235_v59 = vld [vmem:[#allocation5 + $0xc] sm:$0xf0]  ;;  %v1241_v60 = vld [vmem:[#allocation5 + $0x8] sm:$0xf]  ;;  %v1457_v62 = vld [vmem:[#allocation5 + $0x10] sm:$0xf0] }
  0x5d   : > { %v2150_v19 = vsel %vm600_vm1, %v1626_v14, %v599_v18  ;;  %736 = vmatpush.bf16.msra.mxu3 %v1293_v45  ;;  %v1254_v45 = vor.u32 %v1460_v43, %v1253_v41  ;;  %571 = vmatpush.bf16.msrb.mxu1 %v1250_v42  ;;  %v1380_v63 = vld [vmem:[#allocation13 + $0x70] sm:$0xf]  ;;  %v1420_v39 = vld [vmem:[#allocation13 + $0xc0] sm:$0xf]  ;;  %v1502_v41 = vld [vmem:[#allocation13 + $0xc4] sm:$0xf0] }
  0x5e   : > { %749 = vmatpush.bf16.msra.mxu0 %v1297_v47  ;;  %v1444_v3 = vld [vmem:[#allocation13 + $0xf0] sm:$0xf]  ;;  %v1485_v42 = vld [vmem:[#allocation13 + $0x44] sm:$0xf]  ;;  %v1358_v43 = vld [vmem:[#allocation13 + $0x48] sm:$0xf0] }
  0x5f   : > { %584 = vmatpush.bf16.msra.mxu2 %v1254_v45  ;;  %v1428_v29 = vld [vmem:[#allocation13 + $0xd0] sm:$0xf]  ;;  %v1361_v45 = vor.u32 %v1485_v42, %v1358_v43  ;;  %s1081_s3 = sshll.u32 %s496_s29, 4  ;;  %s1083_s24 = sshll.u32 %s1079_s28, 4  ;;  %s1082_s3 = int_to_ptr.vmem [resolvable:$true] %s1081_s3  ;;  %s1084_s24 = int_to_ptr.hbm [resolvable:$true] %s1083_s24 }
  0x60   : > { %s1068_s2 = scalar_lea.sflag [#allocation4], %s2123_s12  ;;  %s1857_s4 = sshra.s32 %s1084_s24, 4  ;;  %s1858_s4 = int_to_ptr.hbm [resolvable:$true] %s1857_s4 }
  0x61   : > { %737 = vmatpush.bf16.msra.mxu3 %v1285_v51  ;;  %s1859_s9 = scalar_lea.hbm %s1858_s4, 16  ;;  %s1863_s27 = scalar_lea.hbm %s2236_s11, 32 }
  0x62   : > { %750 = vmatpush.bf16.msra.mxu0 %v1289_v53  ;;  %p1860_p1 = scmp.ne.s32.totalorder %s1858_s4, %s1859_s9  ;;  %p1864_p12 = scmp.lt.s32.totalorder %s1858_s4, %s2236_s11 }
  0x63   : > { %p1865_p7 = scmp.lt.s32.totalorder %s1863_s27, %s1859_s9 }
  0x64   : > { %p1861_p3 = pnand %p1860_p1, %p2092_p4 }
  0x65   : > { %738 = vmatpush.bf16.msra.mxu3 %v1277_v57  ;;  %p1866_p8 = por %p1865_p7, %p1864_p12 }
  0x66   : > { %751 = vmatpush.bf16.msra.mxu0 %v1281_v61  ;;  %v1238_v61 = vor.u32 %v1455_v58, %v1235_v59  ;;  %v1350_v58 = vld [vmem:[#allocation13 + $0x38] sm:$0xf0]  ;;  %p1862_p5 = pneg %p1861_p3 }
  0x68   : > { %572 = vmatpush.bf16.msrb.mxu1 %v1238_v61  ;;  %v1499_v61 = vld [vmem:[#allocation13 + $0xb4] sm:$0xf]  ;;  %p1867_p9 = pnand %p1866_p8, %p1862_p5 }
  0x69   : > { %739 = vmatpush.bf16.msra.mxu3 %v1269_v0  ;;  %v1492_v0 = vld [vmem:[#allocation13 + $0x74] sm:$0xf0] }
  0x6a   : > { %752 = vmatpush.bf16.msra.mxu0 %v1273_v1  ;;  %v1242_v1 = vor.u32 %v1457_v62, %v1241_v60  ;;  %v1381_v2 = vor.u32 %v1492_v0, %v1380_v63  ;;  %v1414_v62 = vld [vmem:[#allocation13 + $0xb8] sm:$0xf0]  ;;  %v1340_v0 = vld [vmem:[#allocation13 + $0x20] sm:$0xf] }
  0x6b   : > { %1256 = vmatmul.msk.bf16.vlgmr.msrb.gmra.mxu1 %vm548_vm0, %v2143_v7  ;;  %v1417_v63 = vor.u32 %v1499_v61, %v1414_v62 }
  0x6c   : > { %585 = vmatpush.bf16.msra.mxu2 %v1242_v1  ;;  %1011 = vmatpush.bf16.msra.mxu1 %v1381_v2  ;;  %v1482_v1 = vld [vmem:[#allocation13 + $0x24] sm:$0xf0]  ;;  %v1404_v2 = vld [vmem:[#allocation13 + $0xa0] sm:$0xf] }
  0x6d   : > { %740 = vmatpush.bf16.msra.mxu3 %v1261_v6 }
  0x6f   : > { %1257 = vmatmul.msk.bf16.vlgmr.msra.gmra.mxu2 %vm548_vm0, %v2143_v7  ;;  %v1356_v7 = vld [vmem:[#allocation13 + $0x40] sm:$0xf] }
  0xd2   : > { %v561_v10 = vpop.f32.mrf.mxu1 }
  0xd3   : > { %v562_v11 = vadd.f32 %v561_v10, %v510_v9  ;;  %v1265_v9 = vor.u32 %v1461_v4, %v1262_v5  ;;  %v1508_v4 = vld [vmem:[#allocation13 + $0xf4] sm:$0xf0]  ;;  %v1491_v5 = vld [vmem:[#allocation13 + $0x74] sm:$0xf] }
  0xd4   : > { %v1445_v6 = vor.u32 %v1508_v4, %v1444_v3  ;;  %v1341_v3 = vor.u32 %v1482_v1, %v1340_v0  ;;  %v1498_v4 = vld [vmem:[#allocation13 + $0xa4] sm:$0xf0] }
  0xd5   : > { %593 = vadd.xlane.f32.xlu0 %v562_v11  ;;  %753 = vmatpush.bf16.msra.mxu0 %v1265_v9  ;;  %v1382_v9 = vld [vmem:[#allocation13 + $0x78] sm:$0xf0] }
  0xd6   : > { %1024 = vmatpush.bf16.msrb.mxu2 %v1445_v6  ;;  %v1342_v6 = vld [vmem:[#allocation13 + $0x28] sm:$0xf0] }
  0xda   : > { %v563_v12 = vpop.f32.mrf.mxu1 }
 0x148   : > { %v594_v20 = vpop.xlane.xlu0 %593 }
 0x149   : > { %v602_v21 = vmul.f32 %v2150_v19, %v594_v20  ;;  %v1623_v20 = vld [vmem:[#allocation8] ss:$0 sm:$0xff] }
 0x14b   : > { %v2153_v22 = vsub.f32 %v562_v11, %v602_v21 }
 0x14d   : > { %v604_v23 = vmul.f32 %v2153_v22, %v2153_v22 }
 0x14f   : > { %605 = vadd.xlane.f32.xlu0 %v604_v23 }
 0x1c2   : > { %v606_v10 = vpop.xlane.xlu0 %605 }
 0x1c3   : > { %v607_v11 = vmul.f32 %v606_v10, %v2150_v19  ;;  %v1507_v10 = vld [vmem:[#allocation13 + $0xf4] sm:$0xf] }
 0x1c5   : > { %v608_v12 = vadd.f32 1e-05, %v607_v11  ;;  %v1446_v11 = vld [vmem:[#allocation13 + $0xf8] sm:$0xf0] }
 0x1c7   : > { %1627 = vrsqrt.f32 %v608_v12  ;;  %vm615_vm3 = vweird.f32 %v608_v12 }
 0x1c8   : > { %1629 = vrcp.f32 %v1934_v38  ;;  %v1486_v38 = vld [vmem:[#allocation13 + $0x44] sm:$0xf0] }
 0x1c9   : > { %v1357_v40 = vor.u32 %v1486_v38, %v1356_v7 }
 0x1cd   : > { %v1628_v13 = vpop.eup %1627 }
 0x1ce   : > { %v610_v14 = vmul.f32 %v1628_v13, %v608_v12  ;;  %vm616_vm2 = vweird.f32 %v1628_v13  ;;  %v1630_v44 = vpop.eup %1629  ;;  %v1385_v12 = vor.u32 %v1491_v5, %v1382_v9  ;;  %v1481_v5 = vld [vmem:[#allocation13 + $0x24] sm:$0xf]  ;;  %v1405_v9 = vor.u32 %v1498_v4, %v1404_v2 }
 0x1cf   : > { %vm617_vm4 = vmor %vm615_vm3, %vm616_vm2  ;;  %v765_v46 = vmul.f32 256.0, %v1630_v44  ;;  %vm769_vm5 = vweird.f32 %v1630_v44 }
 0x1d0   : > { %v611_v15 = vmul.f32 %v1628_v13, %v610_v14  ;;  %v1372_v14 = vld [vmem:[#allocation13 + $0x60] sm:$0xf]  ;;  %1037 = vmatpush.bf16.msrb.mxu3 %v1385_v12  ;;  %v1406_v12 = vld [vmem:[#allocation13 + $0xa8] sm:$0xf0] }
 0x1d1   : > { %v766_v47 = vsub.f32 1.0, %v765_v46  ;;  %v1501_v46 = vld [vmem:[#allocation13 + $0xc4] sm:$0xf] }
 0x1d2   : > { %v612_v16 = vmul.f32 0.5, %v611_v15  ;;  %v1490_v15 = vld [vmem:[#allocation13 + $0x64] sm:$0xf0] }
 0x1d3   : > { %v767_v48 = vmul.f32 %v1630_v44, %v766_v47  ;;  %v1422_v47 = vld [vmem:[#allocation13 + $0xc8] sm:$0xf0] }
 0x1d4   : > { %v613_v17 = vsub.f32 1.5, %v612_v16  ;;  %v1436_v16 = vld [vmem:[#allocation13 + $0xe0] sm:$0xf] }
 0x1d5   : > { %v768_v49 = vadd.f32 %v1630_v44, %v767_v48  ;;  %v1425_v48 = vor.u32 %v1501_v46, %v1422_v47 }
 0x1d6   : > { %v614_v18 = vmul.f32 %v1628_v13, %v613_v17  ;;  %v1373_v17 = vor.u32 %v1490_v15, %v1372_v14  ;;  %v1332_v14 = vld [vmem:[#allocation13 + $0x10] sm:$0xf]  ;;  %v1480_v15 = vld [vmem:[#allocation13 + $0x14] sm:$0xf0] }
 0x1d7   : > { %v2162_v50 = vsel %vm769_vm5, %v1630_v44, %v768_v49  ;;  %v1421_v44 = vor.u32 %v1502_v41, %v1420_v39  ;;  %v1348_v49 = vld [vmem:[#allocation13 + $0x30] sm:$0xf] }
 0x1d8   : > { %v618_v21 = vsel %vm617_vm4, %v1628_v13, %v614_v18  ;;  %v1449_v13 = vor.u32 %v1507_v10, %v1446_v11  ;;  %v1506_v18 = vld [vmem:[#allocation13 + $0xe4] sm:$0xf0]  ;;  %1012 = vmatpush.bf16.msra.mxu1 %v1373_v17  ;;  %v1345_v10 = vor.u32 %v1481_v5, %v1342_v6  ;;  %v1497_v11 = vld [vmem:[#allocation13 + $0xa4] sm:$0xf]  ;;  %v1333_v17 = vor.u32 %v1480_v15, %v1332_v14  ;;  %v845_v5 = vld [vmem:[%s2235_s10] sm:$0x3] }
 0x1d9   : > { %v619_v23 = vmul.f32 %v618_v21, %v2153_v22  ;;  %v1374_v21 = vld [vmem:[#allocation13 + $0x68] sm:$0xf0]  ;;  %v512_v14 = vperm.slane %v2147_v8, 2 }
 0x1da   : > { %1050 = vmatpush.bf16.msrb.mxu0 %v1449_v13  ;;  %v1409_v13 = vor.u32 %v1497_v11, %v1406_v12  ;;  %v511_v11 = vperm.slane %v2147_v8, 1  ;;  %v848_v12 = vperm.slane %v845_v5, 1 }
 0x1db   : > { %v623_v25 = vmul.f32 %v1623_v20, %v619_v23  ;;  %v1489_v20 = vld [vmem:[#allocation13 + $0x64] sm:$0xf]  ;;  %v1437_v23 = vor.u32 %v1506_v18, %v1436_v16  ;;  %v1396_v16 = vld [vmem:[#allocation13 + $0x90] sm:$0xf]  ;;  %v1496_v18 = vld [vmem:[#allocation13 + $0x94] sm:$0xf0] }
 0x1dd   : > { %v627_v26 = vadd.f32 %v1624_v24, %v623_v25  ;;  %v1377_v24 = vor.u32 %v1489_v20, %v1374_v21  ;;  %v1505_v25 = vld [vmem:[#allocation13 + $0xe4] sm:$0xf]  ;;  %1025 = vmatpush.bf16.msrb.mxu2 %v1437_v23  ;;  %v1479_v20 = vld [vmem:[#allocation13 + $0x14] sm:$0xf]  ;;  %v1334_v21 = vld [vmem:[#allocation13 + $0x18] sm:$0xf0]  ;;  %v1397_v23 = vor.u32 %v1496_v18, %v1396_v16 }
 0x1df   : > { %v628_v19 = vmul.f32 0.2, %v627_v26  ;;  %1038 = vmatpush.bf16.msrb.mxu3 %v1377_v24  ;;  %v1337_v24 = vor.u32 %v1479_v20, %v1334_v21 }
 0x1e1   : > { %v629_v27 = vmax.f32 %v627_v26, %v628_v19  ;;  %v1438_v26 = vld [vmem:[#allocation13 + $0xe8] sm:$0xf0] }
 0x1e2   : > { %v1441_v19 = vor.u32 %v1505_v25, %v1438_v26  ;;  %v1495_v25 = vld [vmem:[#allocation13 + $0x94] sm:$0xf]  ;;  %v1398_v26 = vld [vmem:[#allocation13 + $0x98] sm:$0xf0] }
 0x1e3   : > { %v630_v28 = vpack.c.bf16 %v629_v27, %v629_v27  ;;  %v1364_v27 = vld [vmem:[#allocation13 + $0x50] sm:$0xf] }
 0x1e4   : > { %1051 = vmatpush.bf16.msrb.mxu0 %v1441_v19  ;;  %v1324_v19 = vld [vmem:[#allocation13] sm:$0xf] }
 0x1e5   : > { %741 = vmatmul.bf16.vlgmr.msra.gmra.mxu3 %v630_v28  ;;  %754 = vmatmul.bf16.vlgmr.msra.gmra.mxu0 %v630_v28  ;;  %v1488_v28 = vld [vmem:[#allocation13 + $0x54] sm:$0xf0] }
 0x262   : > { %v755_v30 = vpop.f32.mrf.mxu0 }
 0x263   : > { %v756_v34 = vadd.f32 %v755_v30, %v650_v31  ;;  %v1365_v30 = vor.u32 %v1488_v28, %v1364_v27  ;;  %v1504_v31 = vld [vmem:[#allocation13 + $0xd4] sm:$0xf0]  ;;  %v1401_v27 = vor.u32 %v1495_v25, %v1398_v26  ;;  %v1478_v28 = vld [vmem:[#allocation13 + $0x4] sm:$0xf0] }
 0x265   : > { %1013 = vmatpush.bf16.msra.mxu1 %v1365_v30  ;;  %v1494_v30 = vld [vmem:[#allocation13 + $0x84] sm:$0xf0] }
 0x268   : > { %v742_v33 = vpop.f32.mrf.mxu3 }
 0x269   : > { %v743_v35 = vadd.f32 %v742_v33, %v649_v32  ;;  %v1487_v32 = vld [vmem:[#allocation13 + $0x54] sm:$0xf]  ;;  %v1366_v33 = vld [vmem:[#allocation13 + $0x58] sm:$0xf0]  ;;  %1014 = vmatpush.bf16.msra.mxu1 %v1357_v40 }
 0x26a   : > { %v757_v36 = vpop.f32.mrf.mxu0 }
 0x26b   : > { %v761_v22 = vadd.f32 %v756_v34, %v743_v35  ;;  %v1503_v36 = vld [vmem:[#allocation13 + $0xd4] sm:$0xf] }
 0x26d   : > { %762 = vadd.xlane.f32.xlu1 %v761_v22  ;;  %v1430_v22 = vld [vmem:[#allocation13 + $0xd8] sm:$0xf0] }
 0x270   : > { %v744_v37 = vpop.f32.mrf.mxu3 }
 0x271   : > { %v1433_v37 = vor.u32 %v1503_v36, %v1430_v22  ;;  %v1390_v22 = vld [vmem:[#allocation13 + $0x88] sm:$0xf0] }
 0x273   : > { %1052 = vmatpush.bf16.msrb.mxu0 %v1433_v37 }
 0x277   : > { %1053 = vmatpush.bf16.msrb.mxu0 %v1425_v48 }
 0x27b   : > { %1054 = vmatpush.bf16.msrb.mxu0 %v1417_v63 }
 0x27f   : > { %1055 = vmatpush.bf16.msrb.mxu0 %v1409_v13 }
 0x283   : > { %1056 = vmatpush.bf16.msrb.mxu0 %v1401_v27 }
 0x2e0   : > { %v763_v51 = vpop.xlane.xlu1 %762 }
 0x2e1   : > { %v771_v52 = vmul.f32 %v2162_v50, %v763_v51  ;;  %v1484_v51 = vld [vmem:[#allocation13 + $0x34] sm:$0xf0] }
 0x2e3   : > { %v2165_v53 = vsub.f32 %v743_v35, %v771_v52  ;;  %v2167_v54 = vsub.f32 %v756_v34, %v771_v52  ;;  %v1429_v34 = vor.u32 %v1504_v31, %v1428_v29  ;;  %v1369_v35 = vor.u32 %v1487_v32, %v1366_v33  ;;  %v1412_v52 = vld [vmem:[#allocation13 + $0xb0] sm:$0xf]  ;;  %v1388_v29 = vld [vmem:[#allocation13 + $0x80] sm:$0xf]  ;;  %v1477_v33 = vld [vmem:[#allocation13 + $0x4] sm:$0xf] }
 0x2e4   : > { %v1325_v31 = vor.u32 %v1478_v28, %v1324_v19  ;;  %v1389_v32 = vor.u32 %v1494_v30, %v1388_v29 }
 0x2e5   : > { %v774_v55 = vmul.f32 %v2165_v53, %v2165_v53  ;;  %v775_v56 = vmul.f32 %v2167_v54, %v2167_v54  ;;  %1026 = vmatpush.bf16.msrb.mxu2 %v1429_v34  ;;  %1039 = vmatpush.bf16.msrb.mxu3 %v1369_v35  ;;  %v1326_v34 = vld [vmem:[#allocation13 + $0x8] sm:$0xf0]  ;;  %v1493_v35 = vld [vmem:[#allocation13 + $0x84] sm:$0xf] }
 0x2e6   : > { %v1329_v36 = vor.u32 %v1477_v33, %v1326_v34  ;;  %v1393_v37 = vor.u32 %v1493_v35, %v1390_v22 }
 0x2e7   : > { %v776_v57 = vadd.f32 %v775_v56, %v774_v55  ;;  %v1349_v55 = vor.u32 %v1484_v51, %v1348_v49  ;;  %v1500_v56 = vld [vmem:[#allocation13 + $0xb4] sm:$0xf0] }
 0x2e8   : > { %v1413_v59 = vor.u32 %v1500_v56, %v1412_v52  ;;  %1057 = vmatpush.bf16.msrb.mxu0 %v1393_v37 }
 0x2e9   : > { %777 = vadd.xlane.f32.xlu1 %v776_v57  ;;  %1027 = vmatpush.bf16.msrb.mxu2 %v1421_v44  ;;  %v1483_v57 = vld [vmem:[#allocation13 + $0x34] sm:$0xf]  ;;  %v759_v44 = vld [vmem:[%s2232_s7] sm:$0x3] }
 0x2ea   : > { %1040 = vmatpush.bf16.msrb.mxu3 %v1361_v45  ;;  %v1353_v60 = vor.u32 %v1483_v57, %v1350_v58  ;;  %1015 = vmatpush.bf16.msra.mxu1 %v1349_v55  ;;  %v794_v47 = vperm.slane %v759_v44, 0  ;;  %v795_v48 = vperm.slane %v759_v44, 1 }
 0x2ed   : > { %1028 = vmatpush.bf16.msrb.mxu2 %v1413_v59 }
 0x2ee   : > { %1041 = vmatpush.bf16.msrb.mxu3 %v1353_v60  ;;  %1016 = vmatpush.bf16.msra.mxu1 %v1341_v3 }
 0x2f1   : > { %1029 = vmatpush.bf16.msrb.mxu2 %v1405_v9  ;;  %v847_v9 = vperm.slane %v845_v5, 0 }
 0x2f2   : > { %1042 = vmatpush.bf16.msrb.mxu3 %v1345_v10  ;;  %1017 = vmatpush.bf16.msra.mxu1 %v1333_v17 }
 0x2f5   : > { %1030 = vmatpush.bf16.msrb.mxu2 %v1397_v23 }
 0x2f6   : > { %1043 = vmatpush.bf16.msrb.mxu3 %v1337_v24  ;;  %1018 = vmatpush.bf16.msra.mxu1 %v1325_v31 }
 0x2f9   : > { %1031 = vmatpush.bf16.msrb.mxu2 %v1389_v32 }
 0x2fa   : > { %1044 = vmatpush.bf16.msrb.mxu3 %v1329_v36 }
 0x35c   : > { %v778_v7 = vpop.xlane.xlu1 %777 }
 0x35d   : > { %v779_v38 = vmul.f32 %v778_v7, %v2162_v50  ;;  %v760_v50 = vld [vmem:[%s2233_s8] sm:$0x3] }
 0x35e   : > { %v801_v55 = vperm.slane %v760_v50, 0  ;;  %v802_v56 = vperm.slane %v760_v50, 1 }
 0x35f   : > { %v780_v39 = vadd.f32 1e-05, %v779_v38 }
 0x361   : > { %1631 = vrsqrt.f32 %v780_v39  ;;  %vm787_vm7 = vweird.f32 %v780_v39 }
 0x367   : > { %v1632_v40 = vpop.eup %1631 }
 0x368   : > { %v782_v41 = vmul.f32 %v1632_v40, %v780_v39  ;;  %vm788_vm6 = vweird.f32 %v1632_v40 }
 0x369   : > { %vm789_vm8 = vmor %vm787_vm7, %vm788_vm6 }
 0x36a   : > { %v783_v42 = vmul.f32 %v1632_v40, %v782_v41 }
 0x36c   : > { %v784_v43 = vmul.f32 0.5, %v783_v42 }
 0x36e   : > { %v785_v45 = vsub.f32 1.5, %v784_v43 }
 0x370   : > { %v786_v46 = vmul.f32 %v1632_v40, %v785_v45 }
 0x372   : > { %v790_v49 = vsel %vm789_vm8, %v1632_v40, %v786_v46 }
 0x373   : > { %v791_v51 = vmul.f32 %v790_v49, %v2165_v53  ;;  %v792_v52 = vmul.f32 %v790_v49, %v2167_v54  ;;  %v574_v53 = vpop.f32.mrf.mxu1  ;;  %v587_v54 = vpop.f32.mrf.mxu2 }
 0x374   : > { %v575_v16 = vadd.f32 %v574_v53, %v511_v11  ;;  %v588_v25 = vadd.f32 %v587_v54, %v512_v14 }
 0x375   : > { %v798_v57 = vmul.f32 %v794_v47, %v791_v51  ;;  %v799_v58 = vmul.f32 %v795_v48, %v792_v52 }
 0x377   : > { %v805_v59 = vadd.f32 %v801_v55, %v798_v57  ;;  %v806_v60 = vadd.f32 %v802_v56, %v799_v58 }
 0x379   : > { %v807_v61 = vmul.f32 0.2, %v805_v59  ;;  %v808_v62 = vmul.f32 0.2, %v806_v60 }
 0x37b   : > { %v809_v63 = vmax.f32 %v805_v59, %v807_v61  ;;  %v810_v0 = vmax.f32 %v806_v60, %v808_v62  ;;  %v576_v3 = vpop.f32.mrf.mxu1  ;;  %v589_v4 = vpop.f32.mrf.mxu2 }
 0x37d   : > { %v811_v1 = vpack.c.bf16 %v809_v63, %v809_v63  ;;  %v812_v2 = vpack.c.bf16 %v810_v0, %v810_v0 }
 0x37f   : > { %1019 = vmatmul.bf16.vlgmr.msra.gmra.mxu1 %v811_v1  ;;  %1032 = vmatmul.bf16.vlgmr.msrb.gmra.mxu2 %v812_v2 }
 0x380   : > { %1045 = vmatmul.bf16.vlgmr.msrb.gmra.mxu3 %v811_v1  ;;  %1058 = vmatmul.bf16.vlgmr.msrb.gmra.mxu0 %v812_v2 }
 0x3fc   : > { %v1020_v6 = vpop.f32.mrf.mxu1 }
 0x3fd   : > { %v1059_v10 = vpop.f32.mrf.mxu0  ;;  %v1021_v13 = vadd.f32 %v1020_v6, %v847_v9 }
 0x402   : > { %v1033_v15 = vpop.f32.mrf.mxu2 }
 0x403   : > { %v1034_v17 = vadd.f32 %v1033_v15, %v1021_v13  ;;  %v1046_v18 = vpop.f32.mrf.mxu3 }
 0x404   : > { %v1047_v20 = vadd.f32 %v1046_v18, %v848_v12  ;;  %v1022_v21 = vpop.f32.mrf.mxu1 }
 0x405   : > { %v1063_v23 = vadd.f32 %v1034_v17, %v575_v16  ;;  %v1061_v24 = vpop.f32.mrf.mxu0 }
 0x406   : > { %v1060_v26 = vadd.f32 %v1059_v10, %v1047_v20 }
 0x407   : > { %1065 = vst [vmem:[%s496_s29] sm:$0xff] %v1063_v23 }
 0x408   : > { %v1064_v8 = vadd.f32 %v1060_v26, %v588_v25 }
 0x40a   : > { %1066 = vst [vmem:[%s496_s29 + $0x8] sm:$0xff] %v1064_v8  ;;  %v1035_v19 = vpop.f32.mrf.mxu2 }
 0x40b   : > { %v1048_v27 = vpop.f32.mrf.mxu3 }
 0x40c   : > { %1870 = shalt.err (!%p1867_p9)
}
 0x40d   : > { %1536 = dma.vmem_to_hbm [thread:$0]  (%p2092_p4), %s1082_s3, 256, %s1084_s24, %s1068_s2  }
 0x40e PF: > { %s1095_s12 = sand.u32 1, %s1909_s17   ;;  %p2256_p10 = scmp.ge.s32.totalorder %s1921_s20, 2 }
 0x40f   : > { %s1096_s15 = scalar_lea.sflag [#allocation4], %s1095_s12 }
 0x410   : > { %p1562_p13 = pnand %p2256_p10, %p2096_p6 }
 0x412   : > { %p1563_p11 = pneg %p1562_p13 }
 0x414   : > { %1904 = dma.done.wait (%p1563_p11), %s1096_s15, 256  }
 0x415   : > { %1906 = vsyncadd (%p1563_p11), %s1096_s15, 4294967040  ;;  %p27_p0 = scmp.ge.s32.totalorder %s2066_s23, 4   ;;  %s2257_s17 = smov %s1913_s18 }
 0x416   : > { %s2258_s18 = smov %s1917_s19  ;;  %s2259_s19 = smov %s2077_s22 }
 0x417   : > { %s2260_s20 = smov %s2066_s23  ;;  %29 = sbr.rel (!%p27_p0) target bundleno = 15 (0xf), region = 133 }
 0x41c   :  { %1102 = vsyncpa [#allocation3], 1 }
 0x41d   :  { %1104 = vsyncpa [#allocation3 + $0x1], 1 }
 0x41e   :  { %1105 = vsyncpa [#allocation6], 1 }
 0x41f   :  { %1106 = vsyncpa [#allocation9], 1 }
 0x420   :  { %1107 = vsyncpa [#allocation12], 1 }
 0x421   :  { %1108 = vsyncpa [#allocation4], 1 }
 0x422   :  { %1110 = vsyncpa [#allocation4 + $0x1], 1 }

</bundles_post_ra>
